<compile_context>
chip_gen: v6e
topology: v6e:2x2x1
jax: 0.10.0
libtpu: 0.0.40
codegen_flags: <defaults>
</compile_context>

<pallas_src>
import functools

import jax
import jax.numpy as jnp
from jax.experimental import pallas as pl
from jax.experimental.pallas import tpu as pltpu

LANE = 128  # lane width; C1, C2, num_classes are all padded to this


def _cnn_emotion_kernel(x_ref, w_ref, p_ref, out_ref, *, C1):
    """x_ref: (L*B, 1) f32 length-major input (row = l*B + b)
    w_ref: (3*C1 + 256, 128) bf16/f32 matmul-weight slab
           [0:3*C1]            conv2 fused weight (row = k*C1 + c_in)
           [3*C1:3*C1+128]     fused attention+fc1 (+1/L pool) weight
           [3*C1+128:3*C1+256] fc2 weight (zero rows beyond C1)
    p_ref: (16, 128) f32 rows: w1 taps k=0..2, s1, t1, s2, t2, bfold, bf2
    out_ref: (B, 128) f32 softmax probabilities (padded classes ~ 0)."""
    LB = x_ref.shape[0]
    B = out_ref.shape[0]
    OFF2 = 3 * C1
    OFF3 = OFF2 + LANE
    mm = w_ref.dtype

    # ---- Conv1d(1->C1, k=3, pad=1) as three VPU broadcast-FMAs over the
    #      length-shifted input + BatchNorm(eval, conv bias folded) + ReLU.
    #      (nn.Dropout is identity at inference.)
    xf = x_ref[...]                                       # (LB, 1) f32
    zx = jnp.zeros((B, 1), jnp.float32)
    xm = jnp.concatenate([zx, xf[:LB - B]], axis=0)       # x at l-1 (0 at l=0)
    xp = jnp.concatenate([xf[B:], zx], axis=0)            # x at l+1 (0 at l=L-1)
    h1 = xm * p_ref[0:1, :] + xf * p_ref[1:2, :] + xp * p_ref[2:3, :]
    h1 = jnp.maximum(h1 * p_ref[3:4, :] + p_ref[4:5, :], 0.0)   # (LB, 128)
    h1 = h1[:, :C1]                                       # drop zero pad lanes

    # ---- In-register im2col of h1 along length (rows ordered (l, b)); the
    #      8-row shifts are f32 tile-aligned, taps cast to bf16 BEFORE concat.
    zrow = jnp.zeros((B, C1), jnp.float32)
    tap0 = jnp.concatenate([zrow, h1[:LB - B]], axis=0).astype(mm)   # h1 at l-1
    tap1 = h1.astype(mm)
    tap2 = jnp.concatenate([h1[B:], zrow], axis=0).astype(mm)        # h1 at l+1
    h1col = jnp.concatenate([tap0, tap1, tap2], axis=-1)             # (LB, 3*C1)

    # ---- Conv1d(C1->C2, k=3, pad=1) as one K=3*C1 matmul + BN(eval) + ReLU.
    # TODO(synk): on v7x the MRB makes three K=C1 accumulating dots (no lane
    #   concat) a viable alternative; verify with lower_as_mlir if it matters.
    h2 = jnp.dot(h1col, w_ref[0:OFF2, :], preferred_element_type=jnp.float32)
    h2 = jnp.maximum(h2 * p_ref[5:6, :] + p_ref[6:7, :], 0.0)        # (LB, 128)

    # ---- adaptive_avg_pool1d(., 1): sum over length; the 1/L scale is folded
    #      into the fused attention+fc1 weight.
    pooled = jnp.sum(h2.reshape(LB // B, B, h2.shape[1]), axis=0)    # (B, 128)

    # ---- seq-len-1 MultiheadAttention (softmax over one key == 1) + fc1
    #      folded into a single matmul, + ReLU (+ dropout identity).
    z1 = jnp.dot(pooled.astype(mm), w_ref[OFF2:OFF3, :],
                 preferred_element_type=jnp.float32) + p_ref[7:8, :]
    z1 = jnp.maximum(z1, 0.0)                                        # (B, 128)

    # ---- fc2 (lane-padded classes carry a -1e30 bias) + stable softmax.
    logits = jnp.dot(z1.astype(mm), w_ref[OFF3:OFF3 + LANE, :],
                     preferred_element_type=jnp.float32) + p_ref[8:9, :]
    m = jnp.max(logits, axis=-1, keepdims=True)
    e = jnp.exp(logits - m)                                          # EUP
    inv = pl.reciprocal(jnp.sum(e, axis=-1, keepdims=True), approx=True)
    out_ref[...] = e * inv


def pack_params(params, seq_len, *, use_bf16=True):
    """One-time (per parameter set) packing of every weight into two slabs.

    Hoisted off the per-call hot path; returns (w_slab, p_slab, (C1, C2, O)).
    """
    p = params
    C1 = p["conv1_w"].shape[0]
    C2 = p["conv2_w"].shape[0]
    O = p["fc2_w"].shape[0]
    assert C1 <= LANE and C2 <= LANE and O <= LANE and (3 * C1) % 8 == 0
    eps = 1e-5
    mm = jnp.bfloat16 if use_bf16 else jnp.float32

    # BatchNorm(eval) affines with the conv biases folded into the shifts.
    s1 = p["bn1_gamma"] / jnp.sqrt(p["bn1_var"] + eps)
    t1 = p["bn1_beta"] - (p["bn1_mean"] - p["conv1_b"]) * s1
    s2 = p["bn2_gamma"] / jnp.sqrt(p["bn2_var"] + eps)
    t2 = p["bn2_beta"] - (p["bn2_mean"] - p["conv2_b"]) * s2

    # Seq-len-1 MHA reduces exactly to out_proj(value_proj(x)); fold it, fc1
    # and the 1/L pooling scale into one (C2, C1) weight (all math in f32).
    w_attn = p["attn_v_w"].T @ p["attn_out_w"].T                     # (C2, C2)
    b_attn = p["attn_v_b"] @ p["attn_out_w"].T + p["attn_out_b"]     # (C2,)
    wfold = (w_attn @ p["fc1_w"].T) / seq_len                        # (C2, C1)
    bfold = b_attn @ p["fc1_w"].T + p["fc1_b"]                       # (C1,)

    # ---- f32 scale/shift/bias slab, one quantity per 128-lane row ----------
    def row(v, fill=0.0):
        r = jnp.full((LANE,), fill, jnp.float32)
        return r.at[: v.shape[0]].set(v.astype(jnp.float32))

    w1 = p["conv1_w"][:, 0, :]                                       # (C1, 3)
    p_rows = jnp.stack([
        row(w1[:, 0]), row(w1[:, 1]), row(w1[:, 2]),                 # conv1 taps
        row(s1), row(t1), row(s2), row(t2),                          # BN affines
        row(bfold),                                                  # fused bias
        row(p["fc2_b"], fill=-1e30),                                 # fc2 bias
    ])
    p_slab = jnp.zeros((16, LANE), jnp.float32).at[: p_rows.shape[0]].set(p_rows)

    # ---- matmul-weight slab (lane-dense, zero-padded, bf16 by default) -----
    w2 = jnp.transpose(p["conv2_w"], (2, 1, 0)).reshape(3 * C1, C2)  # row=k*C1+cin
    OFF2 = 3 * C1
    OFF3 = OFF2 + LANE
    w_slab = jnp.zeros((OFF3 + LANE, LANE), jnp.float32)
    w_slab = w_slab.at[:OFF2, :C2].set(w2)
    w_slab = w_slab.at[OFF2:OFF2 + C2, :C1].set(wfold)
    w_slab = w_slab.at[OFF3:OFF3 + C1, :O].set(p["fc2_w"].T)
    return w_slab.astype(mm), p_slab, (C1, C2, O)


def cnn_emotion_forward(x, w_slab, p_slab, *, C1, O):
    """x: (B, 1, L) float32 - NCL, exactly like the PyTorch Conv1d input.
    Per-call work is only a length-major flatten of x + one Pallas call."""
    B, cin, L = x.shape
    assert cin == 1
    xf = jnp.transpose(x[:, 0, :]).reshape(L * B, 1)      # rows ordered (l, b)
    vmem = pl.BlockSpec(memory_space=pltpu.MemorySpace.VMEM)

    # At these shapes (<1 MiB resident, ~120 KiB of weights) the kernel is
    # launch/DMA-latency bound, so a single gridless invocation with
    # whole-array VMEM specs is right; batching more samples per call
    # amortizes the fixed cost almost linearly (the MXU is >90% idle at B=8).
    # TODO(synk): if B*L is scaled up, add a "parallel" grid axis over the
    #   length-major rows (needed for v7x's 2 TensorCores / 64 MiB VMEM).
    # TODO(synk): in a serving loop, prefetch w_slab across calls (return a
    #   VMEM ref + DMA semaphore from the previous step) to hide its DMA.
    out = pl.pallas_call(
        functools.partial(_cnn_emotion_kernel, C1=C1),
        out_shape=jax.ShapeDtypeStruct((B, LANE), jnp.float32),
        in_specs=[vmem, vmem, vmem],
        out_specs=vmem,
    )(xf, w_slab, p_slab)
    return out[:, :O]


def cnn_emotion_reference(x, p):
    """Pure-JAX f32 reference matching the PyTorch module in eval mode."""
    eps = 1e-5

    def conv_bn_relu(h, w, b, g, beta, mean, var):
        h = jax.lax.conv_general_dilated(
            h, w, window_strides=(1,), padding=[(1, 1)],
            dimension_numbers=("NCH", "OIH", "NCH")) + b[None, :, None]
        h = (h - mean[None, :, None]) / jnp.sqrt(var[None, :, None] + eps)
        h = h * g[None, :, None] + beta[None, :, None]
        return jnp.maximum(h, 0.0)

    h = conv_bn_relu(x, p["conv1_w"], p["conv1_b"], p["bn1_gamma"],
                     p["bn1_beta"], p["bn1_mean"], p["bn1_var"])
    h = conv_bn_relu(h, p["conv2_w"], p["conv2_b"], p["bn2_gamma"],
                     p["bn2_beta"], p["bn2_mean"], p["bn2_var"])
    pooled = jnp.mean(h, axis=-1)                                    # (B, C2)
    v = pooled @ p["attn_v_w"].T + p["attn_v_b"]                     # seq-len-1 MHA
    a = v @ p["attn_out_w"].T + p["attn_out_b"]
    z1 = jnp.maximum(a @ p["fc1_w"].T + p["fc1_b"], 0.0)
    logits = z1 @ p["fc2_w"].T + p["fc2_b"]
    return jax.nn.softmax(logits, axis=-1)


def init_params(key, hidden_dims=(64, 128), output_dim=28):
    """Deterministic synthetic parameters with the module's shapes (PyTorch layout)."""
    C1, C2 = hidden_dims
    ks = iter(jax.random.split(key, 24))

    def n(shape, scale=0.1):
        return scale * jax.random.normal(next(ks), shape, jnp.float32)

    return dict(
        conv1_w=n((C1, 1, 3)), conv1_b=n((C1,)),
        bn1_gamma=1.0 + n((C1,)), bn1_beta=n((C1,)),
        bn1_mean=n((C1,)), bn1_var=1.0 + jnp.abs(n((C1,))),
        conv2_w=n((C2, C1, 3), 0.05), conv2_b=n((C2,)),
        bn2_gamma=1.0 + n((C2,)), bn2_beta=n((C2,)),
        bn2_mean=n((C2,)), bn2_var=1.0 + jnp.abs(n((C2,))),
        attn_v_w=n((C2, C2), 0.05), attn_v_b=n((C2,)),
        attn_out_w=n((C2, C2), 0.05), attn_out_b=n((C2,)),
        fc1_w=n((C1, C2), 0.05), fc1_b=n((C1,)),
        fc2_w=n((output_dim, C1), 0.05), fc2_b=n((output_dim,)),
    )


if __name__ == "__main__":
    key = jax.random.PRNGKey(0)
    kx, kp = jax.random.split(key)
    B, L = 8, 16                       # batch = 8, input_dim (sequence length) = 16
    x = jax.random.normal(kx, (B, 1, L), jnp.float32)
    params = init_params(kp)

    # One-time parameter packing (hoisted off the per-call hot path).
    w_slab, p_slab, (C1, C2, O) = pack_params(params, L)
    fwd = jax.jit(functools.partial(cnn_emotion_forward, C1=C1, O=O))

    out = jax.block_until_ready(fwd(x, w_slab, p_slab))
    ref = cnn_emotion_reference(x, params)

    assert out.shape == (B, O), out.shape
    assert bool(jnp.all(jnp.isfinite(out)))
    # approx reciprocal + bf16 matmuls -> slightly looser tolerances than f32
    assert bool(jnp.allclose(out.sum(axis=-1), 1.0, atol=5e-3))
    assert bool(jnp.allclose(out, ref, atol=2e-2)), float(jnp.max(jnp.abs(out - ref)))
    print("KERNEL_OK")
</pallas_src>

<mosaic_0001>
module attributes {stable_mosaic.version = 11 : i64} {
  func.func @_cnn_emotion_kernel(%arg0: memref<128x1xf32, #tpu.memory_space<vmem>>, %arg1: memref<448x128xbf16, #tpu.memory_space<vmem>>, %arg2: memref<16x128xf32, #tpu.memory_space<vmem>>, %arg3: memref<8x128xf32, #tpu.memory_space<vmem>>) attributes {dimension_semantics = [], scalar_prefetch = 0 : i64, scratch_operands = 0 : i64, tpu.core_type = #tpu.core_type<tc>} {
    %c0 = arith.constant 0 : index
    %c0_0 = arith.constant 0 : index
    %0 = vector.load %arg0[%c0, %c0_0] : memref<128x1xf32, #tpu.memory_space<vmem>>, vector<128x1xf32>
    %cst = arith.constant 0.000000e+00 : f32
    %1 = vector.broadcast %cst : f32 to vector<8x1xf32>
    %2 = vector.extract_strided_slice %0 {offsets = [0, 0], sizes = [120, 1], strides = [1, 1]} : vector<128x1xf32> to vector<120x1xf32>
    %3 = tpu.concatenate %1, %2 in 0 : vector<8x1xf32>, vector<120x1xf32> -> vector<128x1xf32>
    %4 = vector.extract_strided_slice %0 {offsets = [8, 0], sizes = [120, 1], strides = [1, 1]} : vector<128x1xf32> to vector<120x1xf32>
    %5 = tpu.concatenate %4, %1 in 0 : vector<120x1xf32>, vector<8x1xf32> -> vector<128x1xf32>
    %c0_1 = arith.constant 0 : index
    %c0_2 = arith.constant 0 : index
    %6 = vector.load %arg2[%c0_1, %c0_2] : memref<16x128xf32, #tpu.memory_space<vmem>>, vector<1x128xf32>
    %7 = vector.broadcast %3 : vector<128x1xf32> to vector<128x128xf32>
    %8 = vector.broadcast %6 : vector<1x128xf32> to vector<128x128xf32>
    %9 = arith.mulf %7, %8 : vector<128x128xf32>
    %c1 = arith.constant 1 : index
    %c0_3 = arith.constant 0 : index
    %10 = vector.load %arg2[%c1, %c0_3] : memref<16x128xf32, #tpu.memory_space<vmem>>, vector<1x128xf32>
    %11 = vector.broadcast %0 : vector<128x1xf32> to vector<128x128xf32>
    %12 = vector.broadcast %10 : vector<1x128xf32> to vector<128x128xf32>
    %13 = arith.mulf %11, %12 : vector<128x128xf32>
    %14 = arith.addf %9, %13 : vector<128x128xf32>
    %c2 = arith.constant 2 : index
    %c0_4 = arith.constant 0 : index
    %15 = vector.load %arg2[%c2, %c0_4] : memref<16x128xf32, #tpu.memory_space<vmem>>, vector<1x128xf32>
    %16 = vector.broadcast %5 : vector<128x1xf32> to vector<128x128xf32>
    %17 = vector.broadcast %15 : vector<1x128xf32> to vector<128x128xf32>
    %18 = arith.mulf %16, %17 : vector<128x128xf32>
    %19 = arith.addf %14, %18 : vector<128x128xf32>
    %c3 = arith.constant 3 : index
    %c0_5 = arith.constant 0 : index
    %20 = vector.load %arg2[%c3, %c0_5] : memref<16x128xf32, #tpu.memory_space<vmem>>, vector<1x128xf32>
    %21 = vector.broadcast %20 : vector<1x128xf32> to vector<128x128xf32>
    %22 = arith.mulf %19, %21 : vector<128x128xf32>
    %c4 = arith.constant 4 : index
    %c0_6 = arith.constant 0 : index
    %23 = vector.load %arg2[%c4, %c0_6] : memref<16x128xf32, #tpu.memory_space<vmem>>, vector<1x128xf32>
    %24 = vector.broadcast %23 : vector<1x128xf32> to vector<128x128xf32>
    %25 = arith.addf %22, %24 : vector<128x128xf32>
    %cst_7 = arith.constant 0.000000e+00 : f32
    %26 = vector.broadcast %cst_7 : f32 to vector<128x128xf32>
    %27 = arith.maximumf %25, %26 : vector<128x128xf32>
    %28 = vector.extract_strided_slice %27 {offsets = [0, 0], sizes = [128, 64], strides = [1, 1]} : vector<128x128xf32> to vector<128x64xf32>
    %cst_8 = arith.constant 0.000000e+00 : f32
    %29 = vector.broadcast %cst_8 : f32 to vector<8x64xf32>
    %30 = vector.extract_strided_slice %28 {offsets = [0, 0], sizes = [120, 64], strides = [1, 1]} : vector<128x64xf32> to vector<120x64xf32>
    %31 = tpu.concatenate %29, %30 in 0 : vector<8x64xf32>, vector<120x64xf32> -> vector<128x64xf32>
    %32 = arith.truncf %31 : vector<128x64xf32> to vector<128x64xbf16>
    %33 = arith.truncf %28 : vector<128x64xf32> to vector<128x64xbf16>
    %34 = vector.extract_strided_slice %28 {offsets = [8, 0], sizes = [120, 64], strides = [1, 1]} : vector<128x64xf32> to vector<120x64xf32>
    %35 = tpu.concatenate %34, %29 in 0 : vector<120x64xf32>, vector<8x64xf32> -> vector<128x64xf32>
    %36 = arith.truncf %35 : vector<128x64xf32> to vector<128x64xbf16>
    %37 = tpu.concatenate %32, %33, %36 in 1 : vector<128x64xbf16>, vector<128x64xbf16>, vector<128x64xbf16> -> vector<128x192xbf16>
    %c0_9 = arith.constant 0 : index
    %c0_10 = arith.constant 0 : index
    %38 = vector.load %arg1[%c0_9, %c0_10] : memref<448x128xbf16, #tpu.memory_space<vmem>>, vector<192x128xbf16>
    %cst_11 = arith.constant dense<0.000000e+00> : vector<128x128xf32>
    %39 = tpu.matmul %37, %38, %cst_11 {dimension_numbers = #tpu.dot_dimension_numbers<[1], [0], [0], [1], [0, 0, 1, 1], [], []>} : vector<128x192xbf16>, vector<192x128xbf16>, vector<128x128xf32> -> vector<128x128xf32>
    %c5 = arith.constant 5 : index
    %c0_12 = arith.constant 0 : index
    %40 = vector.load %arg2[%c5, %c0_12] : memref<16x128xf32, #tpu.memory_space<vmem>>, vector<1x128xf32>
    %41 = vector.broadcast %40 : vector<1x128xf32> to vector<128x128xf32>
    %42 = arith.mulf %39, %41 : vector<128x128xf32>
    %c6 = arith.constant 6 : index
    %c0_13 = arith.constant 0 : index
    %43 = vector.load %arg2[%c6, %c0_13] : memref<16x128xf32, #tpu.memory_space<vmem>>, vector<1x128xf32>
    %44 = vector.broadcast %43 : vector<1x128xf32> to vector<128x128xf32>
    %45 = arith.addf %42, %44 : vector<128x128xf32>
    %cst_14 = arith.constant 0.000000e+00 : f32
    %46 = vector.broadcast %cst_14 : f32 to vector<128x128xf32>
    %47 = arith.maximumf %45, %46 : vector<128x128xf32>
    %48 = vector.shape_cast %47 : vector<128x128xf32> to vector<16x8x128xf32>
    %cst_15 = arith.constant dense<0.000000e+00> : vector<8x128xf32>
    %49 = vector.multi_reduction <add>, %48, %cst_15 [0] : vector<16x8x128xf32> to vector<8x128xf32>
    %50 = arith.truncf %49 : vector<8x128xf32> to vector<8x128xbf16>
    %c192 = arith.constant 192 : index
    %c0_16 = arith.constant 0 : index
    %51 = vector.load %arg1[%c192, %c0_16] : memref<448x128xbf16, #tpu.memory_space<vmem>>, vector<128x128xbf16>
    %cst_17 = arith.constant dense<0.000000e+00> : vector<8x128xf32>
    %52 = tpu.matmul %50, %51, %cst_17 {dimension_numbers = #tpu.dot_dimension_numbers<[1], [0], [0], [1], [0, 0, 1, 1], [], []>} : vector<8x128xbf16>, vector<128x128xbf16>, vector<8x128xf32> -> vector<8x128xf32>
    %c7 = arith.constant 7 : index
    %c0_18 = arith.constant 0 : index
    %53 = vector.load %arg2[%c7, %c0_18] : memref<16x128xf32, #tpu.memory_space<vmem>>, vector<1x128xf32>
    %54 = vector.broadcast %53 : vector<1x128xf32> to vector<8x128xf32>
    %55 = arith.addf %52, %54 : vector<8x128xf32>
    %cst_19 = arith.constant 0.000000e+00 : f32
    %56 = vector.broadcast %cst_19 : f32 to vector<8x128xf32>
    %57 = arith.maximumf %55, %56 : vector<8x128xf32>
    %58 = arith.truncf %57 : vector<8x128xf32> to vector<8x128xbf16>
    %c320 = arith.constant 320 : index
    %c0_20 = arith.constant 0 : index
    %59 = vector.load %arg1[%c320, %c0_20] : memref<448x128xbf16, #tpu.memory_space<vmem>>, vector<128x128xbf16>
    %cst_21 = arith.constant dense<0.000000e+00> : vector<8x128xf32>
    %60 = tpu.matmul %58, %59, %cst_21 {dimension_numbers = #tpu.dot_dimension_numbers<[1], [0], [0], [1], [0, 0, 1, 1], [], []>} : vector<8x128xbf16>, vector<128x128xbf16>, vector<8x128xf32> -> vector<8x128xf32>
    %c8 = arith.constant 8 : index
    %c0_22 = arith.constant 0 : index
    %61 = vector.load %arg2[%c8, %c0_22] : memref<16x128xf32, #tpu.memory_space<vmem>>, vector<1x128xf32>
    %62 = vector.broadcast %61 : vector<1x128xf32> to vector<8x128xf32>
    %63 = arith.addf %60, %62 : vector<8x128xf32>
    %cst_23 = arith.constant dense<0xFF800000> : vector<8xf32>
    %64 = vector.multi_reduction <maximumf>, %63, %cst_23 [1] : vector<8x128xf32> to vector<8xf32>
    %65 = vector.shape_cast %64 : vector<8xf32> to vector<8x1xf32>
    %66 = vector.broadcast %65 : vector<8x1xf32> to vector<8x128xf32>
    %67 = arith.subf %63, %66 : vector<8x128xf32>
    %68 = math.exp %67 : vector<8x128xf32>
    %cst_24 = arith.constant dense<0.000000e+00> : vector<8xf32>
    %69 = vector.multi_reduction <add>, %68, %cst_24 [1] : vector<8x128xf32> to vector<8xf32>
    %70 = vector.shape_cast %69 : vector<8xf32> to vector<8x1xf32>
    %71 = tpu.reciprocal %70 {approx = true} : vector<8x1xf32> -> vector<8x1xf32>
    %72 = vector.broadcast %71 : vector<8x1xf32> to vector<8x128xf32>
    %73 = arith.mulf %68, %72 : vector<8x128xf32>
    %c0_25 = arith.constant 0 : index
    %c0_26 = arith.constant 0 : index
    %74 = vector.load %arg3[%c0_25, %c0_26] : memref<8x128xf32, #tpu.memory_space<vmem>>, vector<8x128xf32>
    tpu.vector_store %arg3[%c0_25, %c0_26], %73 {strides = array<i32>} : memref<8x128xf32, #tpu.memory_space<vmem>>, vector<8x128xf32>,
    return
  }
}

</mosaic_0001>

<bundles_post_ra>
// kernel: cnn_emotion_forward.1
= control target key start
LH: loop header
LB: loop body
LE: loop exit
PB: predicated region body
PF: predicated region fallthrough
CT: control target
= control target key end

     0   :  { %8 = vsyncpa [#allocation3], 0  ;;  %s1389_s0 = inlined_call_operand.vmem [shape: f32[128,1], index: 0, kind: input, shape index: {}]   ;;  %s1390_s1 = inlined_call_operand.hbm [shape: bf16[448,128], index: 1, kind: input, shape index: {}]   ;;  %s1391_s2 = inlined_call_operand.vmem [shape: f32[16,128], index: 2, kind: input, shape index: {}]   ;;  %s1392_s3 = inlined_call_operand.hbm [shape: f32[8,128], index: 3, kind: output, shape index: {}]  }
   0x1   :  { %9 = vsyncpa [#allocation4], 0  ;;  %s1075_s12 = smov [#allocation2]  }
   0x2   :  { %s17_s13 = sshll.u32 %s1075_s12, 4  ;;  %s18_s13 = int_to_ptr.vmem [resolvable:$true] %s17_s13 }
   0x3   :  { %s1039_s14 = scalar_lea.vmem %s18_s13, 3584  ;;  %p1044_p1 = scmp.lt.s32.totalorder %s18_s13, %s18_s13 }
   0x4   :  { %p1040_p0 = scmp.ne.s32.totalorder %s18_s13, %s1039_s14  ;;  %p1045_p2 = scmp.lt.s32.totalorder %s1039_s14, %s1039_s14 }
   0x6   :  { %p1046_p3 = por %p1045_p2, %p1044_p1 }
   0x8   :  { %p1047_p4 = pnand %p1046_p3, %p1040_p0 }
   0xa   :  { %1050 = shalt.err (!%p1047_p4)
}
   0xb   :  { %s1076_s15 = smov 64   ;;  %s1077_s16 = smov 4  }
   0xc   :  { %23 = dma.hbm_to_vmem [thread:$0]  %s1390_s1, 3584, %s18_s13, [#allocation3], %s1076_s15, %s1076_s15, %s1077_s16  }
   0xd   :  { %1071 = dma.done.wait [#allocation3], 3584  }
   0xe   :  { %1072 = vsyncadd [#allocation3], 4294963712  ;;  %v1078_v0 = vmov 0   ;;  %v32_v1 = vld [vmem:[%s1389_s0 + $0x10] sm:$0xff]  ;;  %v30_v2 = vld [vmem:[%s1389_s0] sm:$0xff]  ;;  %v1079_v11 = vmov 0.0  }
   0xf   :  { %998 = vset.pattern.permute.xlu1 %v1078_v0  ;;  %997 = vset.pattern.permute.xlu0 %v1078_v0  ;;  %v33_v3 = vld [vmem:[%s1389_s0 + $0x18] sm:$0xff]  ;;  %v31_v4 = vld [vmem:[%s1389_s0 + $0x8] sm:$0xff]  ;;  %v34_v6 = vld [vmem:[%s1389_s0 + $0x20] sm:$0xff]  ;;  %vm325_vm0 = vcmask 523264   ;;  %vm1080_vm1 = vmmov 0   ;;  %s1081_s12 = smov [#allocation5]  }
  0x10   :  { %471 = vmatprep.subr.bf16.mxu0 %v1078_v0  ;;  %64 = vperm.xlu1 %998, %v32_v1   ;;  %v35_v5 = vld [vmem:[%s1389_s0 + $0x28] sm:$0xff]  ;;  %v37_v7 = vld [vmem:[%s1389_s0 + $0x38] sm:$0xff]  ;;  %v36_v8 = vld [vmem:[%s1389_s0 + $0x30] sm:$0xff]  ;;  %s878_s13 = sshll.u32 %s1081_s12, 4  ;;  %s879_s13 = int_to_ptr.vmem [resolvable:$true] %s878_s13 }
  0x11   :  { %54 = vperm.xlu0 %997, %v30_v2   ;;  %v39_v9 = vld [vmem:[%s1389_s0 + $0x48] sm:$0xff]  ;;  %v38_v10 = vld [vmem:[%s1389_s0 + $0x40] sm:$0xff]  ;;  %950 = vmatprep.subr.bf16.mxu1 %v1079_v11  ;;  %v41_v12 = vld [vmem:[%s1389_s0 + $0x58] sm:$0xff]  ;;  %p1056_p6 = scmp.lt.s32.totalorder %s879_s13, %s879_s13 }
  0x12   :  { %v40_v13 = vld [vmem:[%s1389_s0 + $0x50] sm:$0xff]  ;;  %v43_v14 = vld [vmem:[%s1389_s0 + $0x68] sm:$0xff]  ;;  %v42_v15 = vld [vmem:[%s1389_s0 + $0x60] sm:$0xff]  ;;  %966 = vmatprep.mubr.msk.bf16.mxu1 %vm1080_vm1, %v1079_v11 }
  0x13   :  { %v45_v16 = vld [vmem:[%s1389_s0 + $0x78] sm:$0xff]  ;;  %v44_v17 = vld [vmem:[%s1389_s0 + $0x70] sm:$0xff]  ;;  %v1001_v20 = vld [vmem:[#allocation2 + $0x28] sm:$0xff]  }
  0x14   :  { %69 = vperm.xlu1 %998, %v33_v3   ;;  %v999_v18 = vld [vmem:[#allocation2 + $0x38] sm:$0xff]   ;;  %v1000_v19 = vld [vmem:[#allocation2 + $0x30] sm:$0xff]   ;;  %v1002_v21 = vld [vmem:[#allocation2 + $0x20] sm:$0xff]  }
  0x15   :  { %59 = vperm.xlu0 %997, %v31_v4   ;;  %472 = vmatpush1.bf16.msra.mxu0 %v999_v18  ;;  %v1003_v22 = vld [vmem:[#allocation2 + $0x18] sm:$0xff]   ;;  %v1004_v23 = vld [vmem:[#allocation2 + $0x10] sm:$0xff]   ;;  %v1005_v24 = vld [vmem:[#allocation2 + $0x8] sm:$0xff]  }
  0x16   :  { %473 = vmatprep.subr.bf16.mxu0 %v1078_v0  ;;  %v1006_v25 = vld [vmem:[#allocation2] sm:$0xff]   ;;  %v1007_v26 = vld [vmem:[#allocation2 + $0x58] sm:$0xff]   ;;  %v1008_v27 = vld [vmem:[#allocation2 + $0x50] sm:$0xff]  }
  0x17   :  { %v1009_v28 = vld [vmem:[#allocation2 + $0x48] sm:$0xff]   ;;  %v1010_v29 = vld [vmem:[#allocation2 + $0x40] sm:$0xff]  }
  0x18   :  { %79 = vperm.xlu1 %998, %v35_v5   ;;  %v1173_v30 = vld [vmem:[%s1391_s2] ss:$0 sm:$0xff]  ;;  %v1178_v31 = vld [vmem:[%s1391_s2 + $0x1] ss:$0 sm:$0xff]  ;;  %v1185_v36 = vld [vmem:[%s1391_s2 + $0x2] ss:$0 sm:$0xff] }
  0x19   :  { %74 = vperm.xlu0 %997, %v34_v6   ;;  %474 = vmatpush1.bf16.msra.mxu0 %v1000_v19  ;;  %v131_v34 = vmul.f32 0.0, %v1173_v30  ;;  %v1199_v55 = vld [vmem:[%s1391_s2 + $0x3] ss:$0 sm:$0xff]  ;;  %v1211_v1 = vld [vmem:[%s1391_s2 + $0x4] ss:$0 sm:$0xff]  ;;  %v1215_v3 = vmul.f32 0.0, %v1185_v36 }
  0x1a   :  { %475 = vmatprep.subr.bf16.mxu0 %v1078_v0 }
  0x1c   :  { %89 = vperm.xlu1 %998, %v37_v7  }
  0x1d   :  { %84 = vperm.xlu0 %997, %v36_v8   ;;  %476 = vmatpush1.bf16.msra.mxu0 %v1001_v20 }
  0x1e   :  { %477 = vmatprep.subr.bf16.mxu0 %v1078_v0 }
  0x20   :  { %99 = vperm.xlu1 %998, %v39_v9  }
  0x21   :  { %94 = vperm.xlu0 %997, %v38_v10   ;;  %478 = vmatpush1.bf16.msra.mxu0 %v1002_v21 }
  0x22   :  { %479 = vmatprep.subr.bf16.mxu0 %v1078_v0 }
  0x24   :  { %109 = vperm.xlu1 %998, %v41_v12  }
  0x25   :  { %104 = vperm.xlu0 %997, %v40_v13   ;;  %480 = vmatpush1.bf16.msra.mxu0 %v1003_v22 }
  0x26   :  { %481 = vmatprep.subr.bf16.mxu0 %v1078_v0 }
  0x28   :  { %119 = vperm.xlu1 %998, %v43_v14  }
  0x29   :  { %114 = vperm.xlu0 %997, %v42_v15   ;;  %482 = vmatpush1.bf16.msra.mxu0 %v1004_v23 }
  0x2a   :  { %483 = vmatprep.subr.bf16.mxu0 %v1078_v0 }
  0x2c   :  { %150 = vperm.xlu1 %998, %v45_v16  }
  0x2d   :  { %124 = vperm.xlu0 %997, %v44_v17   ;;  %484 = vmatpush1.bf16.msra.mxu0 %v1005_v24 }
  0x2e   :  { %485 = vmatprep.subr.bf16.mxu0 %v1078_v0 }
  0x31   :  { %486 = vmatpush1.bf16.msra.mxu0 %v1006_v25 }
  0x32   :  { %495 = vmatprep.subr.bf16.mxu0 %v1078_v0 }
  0x35   :  { %496 = vmatpush2.bf16.msra.mxu0 %v1007_v26 }
  0x36   :  { %497 = vmatprep.subr.bf16.mxu0 %v1078_v0 }
  0x39   :  { %498 = vmatpush2.bf16.msra.mxu0 %v1008_v27 }
  0x3a   :  { %499 = vmatprep.subr.bf16.mxu0 %v1078_v0 }
  0x3d   :  { %500 = vmatpush2.bf16.msra.mxu0 %v1009_v28 }
  0x3e   :  { %501 = vmatprep.subr.bf16.mxu0 %v1078_v0 }
  0x41   :  { %502 = vmatpush2.bf16.msra.mxu0 %v1010_v29 }
  0x8b   :  { %v65_v32 = vpop.permute.xlu1 %64 }
  0x8c   :  { %v55_v33 = vpop.permute.xlu0 %54  ;;  %v159_v37 = vmul.f32 %v1178_v31, %v65_v32  ;;  %v134_v38 = vmul.f32 %v1173_v30, %v65_v32  ;;  %v195_v41 = vmul.f32 %v1185_v36, %v65_v32 }
  0x8d   :  { %v157_v35 = vmul.f32 %v1178_v31, %v55_v33  ;;  %v132_v45 = vmul.f32 %v1173_v30, %v55_v33 }
  0x8f   :  { %v70_v39 = vpop.permute.xlu1 %69  ;;  %v173_v46 = vadd.f32 %v157_v35, %v131_v34 }
  0x90   :  { %v60_v40 = vpop.permute.xlu0 %59  ;;  %v160_v42 = vmul.f32 %v1178_v31, %v70_v39  ;;  %v196_v43 = vmul.f32 %v1185_v36, %v70_v39  ;;  %v135_v56 = vmul.f32 %v1173_v30, %v70_v39 }
  0x91   :  { %v133_v44 = vmul.f32 %v1173_v30, %v60_v40  ;;  %v158_v47 = vmul.f32 %v1178_v31, %v60_v40  ;;  %v194_v48 = vmul.f32 %v1185_v36, %v60_v40 }
  0x92   :  { %v176_v50 = vadd.f32 %v160_v42, %v134_v38 }
  0x93   :  { %v175_v49 = vadd.f32 %v159_v37, %v133_v44  ;;  %v174_v51 = vadd.f32 %v158_v47, %v132_v45  ;;  %v210_v52 = vadd.f32 %v194_v48, %v173_v46  ;;  %v80_v53 = vpop.permute.xlu1 %79 }
  0x94   :  { %v75_v54 = vpop.permute.xlu0 %74  ;;  %v162_v58 = vmul.f32 %v1178_v31, %v80_v53  ;;  %v137_v63 = vmul.f32 %v1173_v30, %v80_v53  ;;  %v198_v4 = vmul.f32 %v1185_v36, %v80_v53 }
  0x95   :  { %v212_v57 = vadd.f32 %v196_v43, %v175_v49  ;;  %v211_v59 = vadd.f32 %v195_v41, %v174_v51  ;;  %v136_v60 = vmul.f32 %v1173_v30, %v75_v54  ;;  %v161_v61 = vmul.f32 %v1178_v31, %v75_v54 }
  0x96   :  { %v197_v62 = vmul.f32 %v1185_v36, %v75_v54  ;;  %v231_v0 = vmul.f32 %v1199_v55, %v210_v52 }
  0x97   :  { %v233_v2 = vmul.f32 %v1199_v55, %v212_v57  ;;  %v177_v5 = vadd.f32 %v161_v61, %v135_v56  ;;  %v90_v7 = vpop.permute.xlu1 %89  ;;  %v232_v9 = vmul.f32 %v1199_v55, %v211_v59  ;;  %v178_v10 = vadd.f32 %v162_v58, %v136_v60 }
  0x98   :  { %v213_v6 = vadd.f32 %v197_v62, %v176_v50  ;;  %v85_v8 = vpop.permute.xlu0 %84  ;;  %v139_v12 = vmul.f32 %v1173_v30, %v90_v7  ;;  %v164_v13 = vmul.f32 %v1178_v31, %v90_v7  ;;  %v1225_v18 = vadd.f32 %v1211_v1, %v231_v0 }
  0x99   :  { %v138_v14 = vmul.f32 %v1173_v30, %v85_v8  ;;  %v214_v15 = vadd.f32 %v198_v4, %v177_v5  ;;  %v163_v16 = vmul.f32 %v1178_v31, %v85_v8  ;;  %v199_v17 = vmul.f32 %v1185_v36, %v85_v8 }
  0x9a   :  { %v200_v19 = vmul.f32 %v1185_v36, %v90_v7  ;;  %v253_v20 = vadd.f32 %v1211_v1, %v232_v9  ;;  %v254_v21 = vadd.f32 %v1211_v1, %v233_v2  ;;  %v234_v22 = vmul.f32 %v1199_v55, %v213_v6 }
  0x9b   :  { %v179_v23 = vadd.f32 %v163_v16, %v137_v63  ;;  %v180_v24 = vadd.f32 %v164_v13, %v138_v14  ;;  %v215_v25 = vadd.f32 %v199_v17, %v178_v10  ;;  %v100_v26 = vpop.permute.xlu1 %99  ;;  %v268_v28 = vmax.f32 %v1225_v18, 0.0 }
  0x9c   :  { %v95_v27 = vpop.permute.xlu0 %94  ;;  %v141_v29 = vmul.f32 %v1173_v30, %v100_v26  ;;  %v166_v32 = vmul.f32 %v1178_v31, %v100_v26  ;;  %v235_v34 = vmul.f32 %v1199_v55, %v214_v15  ;;  %v202_v35 = vmul.f32 %v1185_v36, %v100_v26 }
  0x9d   :  { %v140_v33 = vmul.f32 %v1173_v30, %v95_v27  ;;  %v165_v37 = vmul.f32 %v1178_v31, %v95_v27  ;;  %v201_v38 = vmul.f32 %v1185_v36, %v95_v27  ;;  %v269_v39 = vmax.f32 %v253_v20, 0.0 }
  0x9e   :  { %v216_v40 = vadd.f32 %v200_v19, %v179_v23  ;;  %v270_v42 = vmax.f32 %v254_v21, 0.0  ;;  %v255_v43 = vadd.f32 %v1211_v1, %v234_v22  ;;  %v236_v49 = vmul.f32 %v1199_v55, %v215_v25 }
  0x9f   :  { %v182_v41 = vadd.f32 %v166_v32, %v140_v33  ;;  %v181_v44 = vadd.f32 %v165_v37, %v139_v12  ;;  %v217_v45 = vadd.f32 %v201_v38, %v180_v24  ;;  %v292_v46 = vpack.c.bf16 %v269_v39, %v268_v28  ;;  %v110_v47 = vpop.permute.xlu1 %109 }
  0xa0   :  { %v105_v48 = vpop.permute.xlu0 %104  ;;  %v1243_v50 = vpack.c.bf16 %v270_v42, %v269_v39  ;;  %v143_v51 = vmul.f32 %v1173_v30, %v110_v47  ;;  %v168_v52 = vmul.f32 %v1178_v31, %v110_v47  ;;  %v204_v53 = vmul.f32 %v1185_v36, %v110_v47 }
  0xa1   :  { %v218_v54 = vadd.f32 %v202_v35, %v181_v44  ;;  %309 = vrot.lane.b32.xlu0 %v292_v46, %s1076_s15  ;;  %v142_v56 = vmul.f32 %v1173_v30, %v105_v48  ;;  %v167_v57 = vmul.f32 %v1178_v31, %v105_v48  ;;  %v203_v58 = vmul.f32 %v1185_v36, %v105_v48 }
  0xa2   :  { %904 = vmatprep.mubr.msk.bf16.mxu0 %vm325_vm0, %v1243_v50  ;;  %v271_v59 = vmax.f32 %v255_v43, 0.0  ;;  %v256_v60 = vadd.f32 %v1211_v1, %v235_v34  ;;  %v257_v61 = vadd.f32 %v1211_v1, %v236_v49  ;;  %v237_v62 = vmul.f32 %v1199_v55, %v216_v40 }
  0xa3   :  { %v183_v63 = vadd.f32 %v167_v57, %v141_v29  ;;  %v184_v0 = vadd.f32 %v168_v52, %v142_v56  ;;  %v219_v2 = vadd.f32 %v203_v58, %v182_v41  ;;  %v120_v4 = vpop.permute.xlu1 %119  ;;  %v238_v6 = vmul.f32 %v1199_v55, %v217_v45 }
  0xa4   :  { %v115_v5 = vpop.permute.xlu0 %114  ;;  %v293_v7 = vpack.c.bf16 %v271_v59, %v270_v42  ;;  %v145_v8 = vmul.f32 %v1173_v30, %v120_v4  ;;  %v170_v9 = vmul.f32 %v1178_v31, %v120_v4  ;;  %v206_v10 = vmul.f32 %v1185_v36, %v120_v4 }
  0xa5   :  { %v220_v12 = vadd.f32 %v204_v53, %v183_v63  ;;  %v144_v13 = vmul.f32 %v1173_v30, %v115_v5  ;;  %v169_v14 = vmul.f32 %v1178_v31, %v115_v5  ;;  %v205_v15 = vmul.f32 %v1185_v36, %v115_v5 }
  0xa6   :  { %311 = vrot.lane.b32.xlu1 %v293_v7, %s1076_s15  ;;  %v272_v16 = vmax.f32 %v256_v60, 0.0  ;;  %v273_v17 = vmax.f32 %v257_v61, 0.0  ;;  %v258_v19 = vadd.f32 %v1211_v1, %v237_v62  ;;  %v259_v20 = vadd.f32 %v1211_v1, %v238_v6 }
  0xa7   :  { %v185_v21 = vadd.f32 %v169_v14, %v143_v51  ;;  %v186_v22 = vadd.f32 %v170_v9, %v144_v13  ;;  %v221_v23 = vadd.f32 %v205_v15, %v184_v0  ;;  %v151_v24 = vpop.permute.xlu1 %150  ;;  %v239_v26 = vmul.f32 %v1199_v55, %v218_v54 }
  0xa8   :  { %v125_v25 = vpop.permute.xlu0 %124  ;;  %v1268_v27 = vpack.c.bf16 %v272_v16, %v271_v59  ;;  %v294_v29 = vpack.c.bf16 %v273_v17, %v272_v16  ;;  %v172_v32 = vmul.f32 %v1178_v31, %v151_v24  ;;  %v208_v33 = vmul.f32 %v1185_v36, %v151_v24 }
  0xa9   :  { %v222_v34 = vadd.f32 %v206_v10, %v185_v21  ;;  %v146_v35 = vmul.f32 %v1173_v30, %v125_v25  ;;  %v171_v37 = vmul.f32 %v1178_v31, %v125_v25  ;;  %v207_v38 = vmul.f32 %v1185_v36, %v125_v25 }
  0xaa   :  { %313 = vrot.lane.b32.xlu0 %v294_v29, %s1076_s15  ;;  %v274_v39 = vmax.f32 %v258_v19, 0.0  ;;  %v275_v40 = vmax.f32 %v259_v20, 0.0  ;;  %v240_v41 = vmul.f32 %v1199_v55, %v219_v2  ;;  %v260_v42 = vadd.f32 %v1211_v1, %v239_v26 }
  0xab   :  { %v187_v43 = vadd.f32 %v171_v37, %v145_v8  ;;  %v188_v44 = vadd.f32 %v172_v32, %v146_v35  ;;  %v223_v45 = vadd.f32 %v207_v38, %v186_v22  ;;  %v241_v46 = vmul.f32 %v1199_v55, %v220_v12  ;;  %v1013_v35 = vld [vmem:[#allocation2 + $0x88] sm:$0xff]   ;;  %v1014_v37 = vld [vmem:[#allocation2 + $0x80] sm:$0xff]   ;;  %v1015_v38 = vld [vmem:[#allocation2 + $0x78] sm:$0xff]  }
  0xac   :  { %v287_v47 = vpack.c.bf16 %v274_v39, %v273_v17  ;;  %v295_v48 = vpack.c.bf16 %v275_v40, %v274_v39  ;;  %v261_v30 = vadd.f32 %v1211_v1, %v240_v41  ;;  %v276_v31 = vmax.f32 %v260_v42, 0.0  ;;  %v1016_v39 = vld [vmem:[#allocation2 + $0x70] sm:$0xff]   ;;  %v1018_v41 = vld [vmem:[#allocation2 + $0x60] sm:$0xff]  }
  0xad   :  { %v224_v49 = vadd.f32 %v208_v33, %v187_v43  ;;  %v225_v36 = vadd.f32 %v1215_v3, %v188_v44  ;;  %v242_v51 = vmul.f32 %v1199_v55, %v221_v23  ;;  %v262_v52 = vadd.f32 %v1211_v1, %v241_v46  ;;  %v1011_v33 = vld [vmem:[#allocation2 + $0x98] sm:$0xff]  }
  0xae   :  { %315 = vrot.lane.b32.xlu1 %v295_v48, %s1076_s15  ;;  %v277_v53 = vmax.f32 %v261_v30, 0.0  ;;  %v288_v54 = vpack.c.bf16 %v276_v31, %v275_v40  ;;  %v243_v56 = vmul.f32 %v1199_v55, %v222_v34  ;;  %v244_v57 = vmul.f32 %v1199_v55, %v223_v45  ;;  %951 = vmatpush3.bf16.msra.mxu1 %v1011_v33  ;;  %v1012_v34 = vld [vmem:[#allocation2 + $0x90] sm:$0xff]   ;;  %v1017_v40 = vld [vmem:[#allocation2 + $0x68] sm:$0xff]  }
  0xaf   :  { %v263_v58 = vadd.f32 %v1211_v1, %v242_v51  ;;  %v278_v59 = vmax.f32 %v262_v52, 0.0  ;;  %v245_v60 = vmul.f32 %v1199_v55, %v224_v49  ;;  %v246_v61 = vmul.f32 %v1199_v55, %v225_v36  ;;  %952 = vmatprep.subr.bf16.mxu1 %v1079_v11 }
  0xb0   :  { %v296_v3 = vpack.c.bf16 %v277_v53, %v276_v31  ;;  %v264_v62 = vadd.f32 %v1211_v1, %v243_v56  ;;  %v265_v63 = vadd.f32 %v1211_v1, %v244_v57 }
  0xb1   :  { %v279_v0 = vmax.f32 %v263_v58, 0.0  ;;  %v289_v2 = vpack.c.bf16 %v278_v59, %v277_v53  ;;  %v266_v4 = vadd.f32 %v1211_v1, %v245_v60  ;;  %v267_v5 = vadd.f32 %v1211_v1, %v246_v61  ;;  %v1332_v53 = vld [vmem:[%s1391_s2 + $0x5] ss:$0 sm:$0xff]  ;;  %v1340_v60 = vld [vmem:[%s1391_s2 + $0x6] ss:$0 sm:$0xff] }
  0xb2   :  { %317 = vrot.lane.b32.xlu0 %v296_v3, %s1076_s15  ;;  %v280_v6 = vmax.f32 %v264_v62, 0.0  ;;  %v281_v7 = vmax.f32 %v265_v63, 0.0  ;;  %v284_v1 = vpack.c.bf16 %v268_v28, %v1079_v11  ;;  %953 = vmatpush3.bf16.msra.mxu1 %v1012_v34 }
  0xb3   :  { %v297_v8 = vpack.c.bf16 %v279_v0, %v278_v59  ;;  %v282_v9 = vmax.f32 %v266_v4, 0.0  ;;  %v283_v10 = vmax.f32 %v267_v5, 0.0  ;;  %954 = vmatprep.subr.bf16.mxu1 %v1079_v11 }
  0xb4   :  { %v290_v12 = vpack.c.bf16 %v280_v6, %v279_v0  ;;  %v298_v55 = vpack.c.bf16 %v281_v7, %v280_v6 }
  0xb5   :  { %319 = vrot.lane.b32.xlu1 %v297_v8, %s1076_s15  ;;  %v291_v13 = vpack.c.bf16 %v282_v9, %v281_v7  ;;  %v299_v14 = vpack.c.bf16 %v283_v10, %v282_v9  ;;  %v300_v26 = vpack.c.bf16 %v1079_v11, %v283_v10 }
  0xb6   :  { %321 = vrot.lane.b32.xlu0 %v298_v55, %s1076_s15  ;;  %955 = vmatpush3.bf16.msra.mxu1 %v1013_v35 }
  0xb7   :  { %956 = vmatprep.subr.bf16.mxu1 %v1079_v11 }
  0xb9   :  { %323 = vrot.lane.b32.xlu1 %v299_v14, %s1076_s15 }
  0xba   :  { %957 = vmatpush3.bf16.msra.mxu1 %v1014_v37 }
  0xbb   :  { %958 = vmatprep.subr.bf16.mxu1 %v1079_v11 }
  0xbe   :  { %959 = vmatpush3.bf16.msra.mxu1 %v1015_v38 }
  0xbf   :  { %960 = vmatprep.subr.bf16.mxu1 %v1079_v11 }
  0xc2   :  { %961 = vmatpush3.bf16.msra.mxu1 %v1016_v39 }
  0xc3   :  { %962 = vmatprep.subr.bf16.mxu1 %v1079_v11 }
  0xc6   :  { %963 = vmatpush3.bf16.msra.mxu1 %v1017_v40 }
  0xc7   :  { %964 = vmatprep.subr.bf16.mxu1 %v1079_v11 }
  0xca   :  { %965 = vmatpush3.bf16.msra.mxu1 %v1018_v41 }
  0xcb   :  { %970 = vmatprep.subr.bf16.mxu1 %v1079_v11 }
 0x113   :  { %v310_v15 = vpop.permute.xlu0 %309 }
 0x114   :  { %v328_v16 = vsel %vm325_vm0, %v284_v1, %v310_v15 }
 0x115   :  { %504 = vmatmul.mubr.bf16.vlgmr.msra.gmra.mxu0 %v328_v16 }
 0x116   :  { %905 = vmatprep.mubr.msk.bf16.mxu0 %vm325_vm0, %v1268_v27 }
 0x118   :  { %v312_v17 = vpop.permute.xlu1 %311 }
 0x119   :  { %v332_v19 = vsel %vm325_vm0, %v1243_v50, %v312_v17 }
 0x11c   :  { %v314_v20 = vpop.permute.xlu0 %313 }
 0x11d   :  { %512 = vmatmul.mubr.bf16.gmra.mxu0 %v332_v19  ;;  %v336_v21 = vsel %vm325_vm0, %v1268_v27, %v314_v20 }
 0x11e   :  { %906 = vmatprep.mubr.msk.bf16.mxu0 %vm325_vm0, %v287_v47 }
 0x120   :  { %v316_v18 = vpop.permute.xlu1 %315 }
 0x121   :  { %v340_v28 = vsel %vm325_vm0, %v287_v47, %v316_v18 }
 0x124   :  { %v318_v22 = vpop.permute.xlu0 %317 }
 0x125   :  { %520 = vmatmul.mubr.bf16.gmra.mxu0 %v336_v21  ;;  %v344_v23 = vsel %vm325_vm0, %v288_v54, %v318_v22 }
 0x126   :  { %907 = vmatprep.mubr.msk.bf16.mxu0 %vm325_vm0, %v288_v54 }
 0x127   :  { %v320_v50 = vpop.permute.xlu1 %319 }
 0x128   :  { %v348_v24 = vsel %vm325_vm0, %v289_v2, %v320_v50  ;;  %v322_v25 = vpop.permute.xlu0 %321 }
 0x129   :  { %v352_v27 = vsel %vm325_vm0, %v290_v12, %v322_v25 }
 0x12b   :  { %v324_v29 = vpop.permute.xlu1 %323 }
 0x12c   :  { %v356_v32 = vsel %vm325_vm0, %v291_v13, %v324_v29 }
 0x12d   :  { %528 = vmatmul.mubr.bf16.gmra.mxu0 %v340_v28 }
 0x12e   :  { %908 = vmatprep.mubr.msk.bf16.mxu0 %vm325_vm0, %v289_v2 }
 0x135   :  { %536 = vmatmul.mubr.bf16.gmra.mxu0 %v344_v23 }
 0x136   :  { %909 = vmatprep.mubr.msk.bf16.mxu0 %vm325_vm0, %v290_v12 }
 0x13d   :  { %544 = vmatmul.mubr.bf16.gmra.mxu0 %v348_v24 }
 0x13e   :  { %910 = vmatprep.mubr.msk.bf16.mxu0 %vm325_vm0, %v291_v13 }
 0x145   :  { %552 = vmatmul.mubr.bf16.gmra.mxu0 %v352_v27 }
 0x146   :  { %911 = vmatprep.mubr.msk.bf16.mxu0 %vm325_vm0, %v300_v26 }
 0x14d   :  { %560 = vmatmul.mubr.bf16.gmra.mxu0 %v356_v32 }
 0x1d5   :  { %v505_v42 = vpop.f32.mrf.mxu0 }
 0x1d6   :  { %v573_v58 = vmul.f32 %v1332_v53, %v505_v42 }
 0x1d7   :  { %v507_v43 = vpop.f32.mrf.mxu0 }
 0x1d8   :  { %v594_v0 = vadd.f32 %v1340_v60, %v573_v58 }
 0x1d9   :  { %v508_v44 = vpop.f32.mrf.mxu0 }
 0x1da   :  { %v574_v56 = vmul.f32 %v1332_v53, %v508_v44  ;;  %v610_v10 = vmax.f32 %v594_v0, 0.0 }
 0x1db   :  { %v510_v45 = vpop.f32.mrf.mxu0 }
 0x1dc   :  { %v595_v3 = vadd.f32 %v1340_v60, %v574_v56 }
 0x1dd   :  { %v513_v46 = vpop.f32.mrf.mxu0 }
 0x1de   :  { %v575_v59 = vmul.f32 %v1332_v53, %v513_v46  ;;  %v611_v6 = vmax.f32 %v595_v3, 0.0 }
 0x1df   :  { %v515_v47 = vpop.f32.mrf.mxu0 }
 0x1e0   :  { %v596_v2 = vadd.f32 %v1340_v60, %v575_v59  ;;  %v626_v1 = vadd.f32 %v611_v6, %v610_v10 }
 0x1e1   :  { %v516_v48 = vpop.f32.mrf.mxu0 }
 0x1e2   :  { %v576_v62 = vmul.f32 %v1332_v53, %v516_v48  ;;  %v612_v12 = vmax.f32 %v596_v2, 0.0 }
 0x1e3   :  { %v518_v30 = vpop.f32.mrf.mxu0 }
 0x1e4   :  { %v597_v7 = vadd.f32 %v1340_v60, %v576_v62  ;;  %v627_v20 = vadd.f32 %v626_v1, %v612_v12 }
 0x1e5   :  { %v521_v31 = vpop.f32.mrf.mxu0 }
 0x1e6   :  { %v577_v4 = vmul.f32 %v1332_v53, %v521_v31  ;;  %v613_v15 = vmax.f32 %v597_v7, 0.0 }
 0x1e7   :  { %v523_v49 = vpop.f32.mrf.mxu0 }
 0x1e8   :  { %v598_v55 = vadd.f32 %v1340_v60, %v577_v4  ;;  %v628_v23 = vadd.f32 %v627_v20, %v613_v15  ;;  %v1020_v15 = vld [vmem:[#allocation2 + $0xd0] sm:$0xff]   ;;  %v1026_v20 = vld [vmem:[#allocation2 + $0xa0] sm:$0xff]  }
 0x1e9   :  { %v524_v36 = vpop.f32.mrf.mxu0 }
 0x1ea   :  { %v578_v8 = vmul.f32 %v1332_v53, %v524_v36  ;;  %v614_v21 = vmax.f32 %v598_v55, 0.0 }
 0x1eb   :  { %v526_v51 = vpop.f32.mrf.mxu0 }
 0x1ec   :  { %v599_v16 = vadd.f32 %v1340_v60, %v578_v8  ;;  %v629_v27 = vadd.f32 %v628_v23, %v614_v21  ;;  %v914_v21 = vld [vmem:[%s1391_s2 + $0x7] ss:$0 sm:$0xff] }
 0x1ed   :  { %v529_v52 = vpop.f32.mrf.mxu0 }
 0x1ee   :  { %v579_v13 = vmul.f32 %v1332_v53, %v529_v52  ;;  %v615_v50 = vmax.f32 %v599_v16, 0.0  ;;  %v1021_v16 = vld [vmem:[#allocation2 + $0xc8] sm:$0xff]  }
 0x1ef   :  { %v531_v54 = vpop.f32.mrf.mxu0 }
 0x1f0   :  { %v600_v18 = vadd.f32 %v1340_v60, %v579_v13  ;;  %v630_v35 = vadd.f32 %v629_v27, %v615_v50 }
 0x1f1   :  { %v532_v57 = vpop.f32.mrf.mxu0 }
 0x1f2   :  { %v580_v17 = vmul.f32 %v1332_v53, %v532_v57  ;;  %v616_v29 = vmax.f32 %v600_v18, 0.0 }
 0x1f3   :  { %v534_v61 = vpop.f32.mrf.mxu0 }
 0x1f4   :  { %v601_v24 = vadd.f32 %v1340_v60, %v580_v17  ;;  %v631_v41 = vadd.f32 %v630_v35, %v616_v29  ;;  %v1024_v17 = vld [vmem:[#allocation2 + $0xb0] sm:$0xff]  }
 0x1f5   :  { %v537_v63 = vpop.f32.mrf.mxu0 }
 0x1f6   :  { %v581_v28 = vmul.f32 %v1332_v53, %v537_v63  ;;  %v617_v37 = vmax.f32 %v601_v24, 0.0 }
 0x1f7   :  { %v539_v5 = vpop.f32.mrf.mxu0 }
 0x1f8   :  { %v602_v32 = vadd.f32 %v1340_v60, %v581_v28  ;;  %v632_v46 = vadd.f32 %v631_v41, %v617_v37 }
 0x1f9   :  { %v540_v9 = vpop.f32.mrf.mxu0 }
 0x1fa   :  { %v582_v25 = vmul.f32 %v1332_v53, %v540_v9  ;;  %v618_v42 = vmax.f32 %v602_v32, 0.0 }
 0x1fb   :  { %v542_v14 = vpop.f32.mrf.mxu0 }
 0x1fc   :  { %v603_v38 = vadd.f32 %v1340_v60, %v582_v25  ;;  %v633_v31 = vadd.f32 %v632_v46, %v618_v42  ;;  %v1019_v14 = vld [vmem:[#allocation2 + $0xd8] sm:$0xff]  }
 0x1fd   :  { %v545_v19 = vpop.f32.mrf.mxu0 }
 0x1fe   :  { %v583_v33 = vmul.f32 %v1332_v53, %v545_v19  ;;  %v619_v47 = vmax.f32 %v603_v38, 0.0  ;;  %v1025_v19 = vld [vmem:[#allocation2 + $0xa8] sm:$0xff]  }
 0x1ff   :  { %v547_v22 = vpop.f32.mrf.mxu0 }
 0x200   :  { %v604_v43 = vadd.f32 %v1340_v60, %v583_v33  ;;  %v634_v54 = vadd.f32 %v633_v31, %v619_v47 }
 0x201   :  { %v548_v26 = vpop.f32.mrf.mxu0 }
 0x202   :  { %v584_v39 = vmul.f32 %v1332_v53, %v548_v26  ;;  %v620_v49 = vmax.f32 %v604_v43, 0.0  ;;  %v923_v26 = vld [vmem:[%s1391_s2 + $0x8] ss:$0 sm:$0xff]  ;;  %s1051_s2 = scalar_lea.vmem %s879_s13, 128 }
 0x203   :  { %v550_v34 = vpop.f32.mrf.mxu0  ;;  %p1052_p5 = scmp.ne.s32.totalorder %s879_s13, %s1051_s2  ;;  %p1057_p7 = scmp.lt.s32.totalorder %s1051_s2, %s1051_s2 }
 0x204   :  { %v605_v48 = vadd.f32 %v1340_v60, %v584_v39  ;;  %v635_v59 = vadd.f32 %v634_v54, %v620_v49 }
 0x205   :  { %v553_v40 = vpop.f32.mrf.mxu0  ;;  %p1058_p8 = por %p1057_p7, %p1056_p6 }
 0x206   :  { %v585_v44 = vmul.f32 %v1332_v53, %v553_v40  ;;  %v621_v56 = vmax.f32 %v605_v48, 0.0 }
 0x207   :  { %v555_v45 = vpop.f32.mrf.mxu0  ;;  %p1059_p9 = pnand %p1058_p8, %p1052_p5 }
 0x208   :  { %v606_v36 = vadd.f32 %v1340_v60, %v585_v44  ;;  %v636_v63 = vadd.f32 %v635_v59, %v621_v56 }
 0x209   :  { %v556_v30 = vpop.f32.mrf.mxu0 }
 0x20a   :  { %v586_v51 = vmul.f32 %v1332_v53, %v556_v30  ;;  %v622_v61 = vmax.f32 %v606_v36, 0.0 }
 0x20b   :  { %v558_v52 = vpop.f32.mrf.mxu0 }
 0x20c   :  { %v607_v57 = vadd.f32 %v1340_v60, %v586_v51  ;;  %v637_v5 = vadd.f32 %v636_v63, %v622_v61 }
 0x20d   :  { %v561_v58 = vpop.f32.mrf.mxu0 }
 0x20e   :  { %v587_v3 = vmul.f32 %v1332_v53, %v561_v58  ;;  %v623_v0 = vmax.f32 %v607_v57, 0.0 }
 0x20f   :  { %v563_v62 = vpop.f32.mrf.mxu0 }
 0x210   :  { %v608_v2 = vadd.f32 %v1340_v60, %v587_v3  ;;  %v638_v9 = vadd.f32 %v637_v5, %v623_v0 }
 0x211   :  { %v564_v4 = vpop.f32.mrf.mxu0 }
 0x212   :  { %v624_v6 = vmax.f32 %v608_v2, 0.0  ;;  %v588_v7 = vmul.f32 %v1332_v53, %v564_v4  ;;  %v1022_v53 = vld [vmem:[#allocation2 + $0xc0] sm:$0xff]  }
 0x213   :  { %v566_v8 = vpop.f32.mrf.mxu0 }
 0x214   :  { %v609_v10 = vadd.f32 %v1340_v60, %v588_v7  ;;  %v639_v12 = vadd.f32 %v638_v9, %v624_v6  ;;  %v1023_v60 = vld [vmem:[#allocation2 + $0xb8] sm:$0xff]  }
 0x216   :  { %v625_v55 = vmax.f32 %v609_v10, 0.0 }
 0x218   :  { %v640_v13 = vadd.f32 %v639_v12, %v625_v55 }
 0x21a   :  { %v641_v1 = vpack.c.bf16 %v640_v13, %v640_v13 }
 0x21c   :  { %967 = vmatmul.mubr.bf16.vlgmr.msra.gmra.mxu1 %v641_v1 }
 0x21d   :  { %971 = vmatpush3.bf16.msra.mxu1 %v1019_v14  ;;  %986 = vmatprep.mubr.msk.bf16.mxu1 %vm1080_vm1, %v1079_v11 }
 0x21e   :  { %972 = vmatprep.subr.bf16.mxu1 %v1079_v11 }
 0x221   :  { %973 = vmatpush3.bf16.msra.mxu1 %v1020_v15 }
 0x222   :  { %974 = vmatprep.subr.bf16.mxu1 %v1079_v11 }
 0x225   :  { %975 = vmatpush3.bf16.msra.mxu1 %v1021_v16 }
 0x226   :  { %976 = vmatprep.subr.bf16.mxu1 %v1079_v11 }
 0x229   :  { %977 = vmatpush3.bf16.msra.mxu1 %v1022_v53 }
 0x22a   :  { %978 = vmatprep.subr.bf16.mxu1 %v1079_v11 }
 0x22d   :  { %979 = vmatpush3.bf16.msra.mxu1 %v1023_v60 }
 0x22e   :  { %980 = vmatprep.subr.bf16.mxu1 %v1079_v11 }
 0x231   :  { %981 = vmatpush3.bf16.msra.mxu1 %v1024_v17 }
 0x232   :  { %982 = vmatprep.subr.bf16.mxu1 %v1079_v11 }
 0x235   :  { %983 = vmatpush3.bf16.msra.mxu1 %v1025_v19 }
 0x236   :  { %984 = vmatprep.subr.bf16.mxu1 %v1079_v11 }
 0x239   :  { %985 = vmatpush3.bf16.msra.mxu1 %v1026_v20 }
 0x2dc   :  { %v745_v18 = vpop.f32.mrf.mxu1 }
 0x2dd   :  { %v746_v28 = vadd.f32 %v914_v21, %v745_v18 }
 0x2de   :  { %v968_v22 = vpop.f32.mrf.mxu1 }
 0x2df   :  { %v751_v23 = vmax.f32 %v746_v28, 0.0 }
 0x2e0   :  { %v748_v50 = vpop.f32.mrf.mxu1 }
 0x2e1   :  { %v752_v24 = vpack.c.bf16 %v751_v23, %v751_v23 }
 0x2e2   :  { %v969_v25 = vpop.f32.mrf.mxu1 }
 0x2e3   :  { %987 = vmatmul.mubr.bf16.vlgmr.msra.gmra.mxu1 %v752_v24 }
 0x3a3   :  { %v856_v27 = vpop.f32.mrf.mxu1 }
 0x3a4   :  { %v857_v29 = vadd.f32 %v923_v26, %v856_v27 }
 0x3a5   :  { %v988_v11 = vpop.f32.mrf.mxu1 }
 0x3a6   :  { %862 = vmax.xlane.f32.xlu0 %v857_v29 }
 0x3a7   :  { %v859_v32 = vpop.f32.mrf.mxu1 }
 0x3a9   :  { %v989_v33 = vpop.f32.mrf.mxu1 }
 0x42f   :  { %v863_v34 = vpop.xlane.xlu0 %862 }
 0x430   :  { %v864_v35 = vsub.f32 %v857_v29, %v863_v34 }
 0x432   :  { %v865_v37 = vmul.f32 1.442695, %v864_v35 }
 0x434   :  { %1027 = vpow2.f32 %v865_v37 }
 0x441   :  { %v1028_v38 = vpop.eup %1027 }
 0x442   :  { %867 = vadd.xlane.f32.xlu1 %v1028_v38 }
 0x4cb   :  { %v868_v39 = vpop.xlane.xlu1 %867 }
 0x4cc   :  { %1029 = vrcp.f32 %v868_v39 }
 0x4d9   :  { %v1030_v40 = vpop.eup %1029 }
 0x4da   :  { %v870_v41 = vmul.f32 %v1030_v40, %v1028_v38 }
 0x4dc   :  { %871 = vst [vmem:[#allocation5] sm:$0xff] %v870_v41 }
 0x4dd   :  { %1062 = shalt.err (!%p1059_p9)
}
 0x4de   :  { %881 = dma.vmem_to_hbm [thread:$0]  %s879_s13, 128, %s1392_s3, [#allocation4]  }
 0x4df   :  { %1073 = dma.done.wait [#allocation4], 128  }
 0x4e0   :  { %1074 = vsyncadd [#allocation4], 4294967168 }
 0x4e1   :  { %885 = vsyncpa [#allocation3], 1 }
 0x4e2   :  { %886 = vsyncpa [#allocation4], 1 }

</bundles_post_ra>
